<compile_context>
chip_gen: v5e
topology: v5e:2x2
jax: 0.10.0
libtpu: 0.0.40
codegen_flags: <defaults>
</compile_context>

<pallas_src>
import jax
import jax.numpy as jnp
from jax.experimental import pallas as pl
from jax.experimental.pallas import tpu as pltpu

NB_CLASSES = 101
LANE = 128
SUBLANE = 8


def _round_up(x, m):
    return (x + m - 1) // m * m


def _cdiv(a, b):
    return (a + b - 1) // b


# ----------------------------------------------------------------------------
# Pallas kernels
# ----------------------------------------------------------------------------
def _linear_kernel(x_ref, w_ref, b_ref, o_ref):
    # x: (bm, K=404), w: (K, Np=128), b: (1, Np) -> o: (bm, Np); all f32.
    o_ref[...] = (
        jnp.dot(x_ref[...], w_ref[...], preferred_element_type=jnp.float32)
        + b_ref[...]
    )


def _mean_kernel(x_ref, o_ref):
    # x: (bm, T, C) -> o: (bm, C); mean over the small T axis (sublane
    # reduction, C on the lane axis).
    x = x_ref[...]
    o_ref[...] = jnp.sum(x, axis=1) * jnp.float32(1.0 / x.shape[1])


# ----------------------------------------------------------------------------
# Wrappers
# ----------------------------------------------------------------------------
def _pick_block_m(b, cap):
    """Sublane-aligned batch tile.  Large tiles (~85%+ of streaming roofline)
    but always >=2 grid blocks for B > 16 so both v7x TCs get work."""
    b = max(b, 1)
    if b <= 2 * SUBLANE:
        return _round_up(b, SUBLANE)
    return min(cap, _round_up(_cdiv(b, 2), SUBLANE))


def tta_linear(x_flat, w_t_npad, b_npad):
    """x_flat: (B, K=404) f32.  w_t_npad: (K, Np=128) pre-transposed, N-padded.
    b_npad: (1, Np).  Returns (B, Np); caller slices the lane dim to 101."""
    B, K = x_flat.shape
    Kw, Np = w_t_npad.shape
    assert Kw == K
    block_m = _pick_block_m(B, 1024)
    return pl.pallas_call(
        _linear_kernel,
        out_shape=jax.ShapeDtypeStruct((B, Np), jnp.float32),
        grid=(_cdiv(B, block_m),),
        in_specs=[
            # K = full array dim -> legal block, no K padding / extra DMA.
            pl.BlockSpec((block_m, K), lambda i: (i, 0)),
            pl.BlockSpec((K, Np), lambda i: (0, 0)),   # weight resident
            pl.BlockSpec((1, Np), lambda i: (0, 0)),   # bias resident
        ],
        out_specs=pl.BlockSpec((block_m, Np), lambda i: (i, 0)),
        compiler_params=pltpu.CompilerParams(
            dimension_semantics=("parallel",)
        ),
    )(x_flat, w_t_npad, b_npad)


def tta_mean(x):
    """x: (B, T, C) f32 -> (B, C), mean over dim=1 (matches torch)."""
    B, T, C = x.shape
    # Cap at 512 rows: the (block_m, T, C) block sublane-pads T 4->8 in VMEM.
    block_m = _pick_block_m(B, 512)
    return pl.pallas_call(
        _mean_kernel,
        out_shape=jax.ShapeDtypeStruct((B, C), jnp.float32),
        grid=(_cdiv(B, block_m),),
        # T and C equal the full array dims -> legal block, no padding needed.
        in_specs=[pl.BlockSpec((block_m, T, C), lambda i: (i, 0, 0))],
        out_specs=pl.BlockSpec((block_m, C), lambda i: (i, 0)),
        compiler_params=pltpu.CompilerParams(
            dimension_semantics=("parallel",)
        ),
    )(x)


class TTAModelPallas:
    """JAX/Pallas port of TTAmodelclass."""

    def __init__(self, nb_transform, simple_mean=False, key=None):
        self.nb_transform = nb_transform
        self.simple_mean = simple_mean
        fan_in = NB_CLASSES * nb_transform
        self.fan_in = fan_in

        # torch: self.linear.weight.data.fill_(1)  -> (N=101, K=fan_in)
        self.weight = jnp.ones((NB_CLASSES, fan_in), dtype=jnp.float32)
        # torch default bias init U(-1/sqrt(fan_in), 1/sqrt(fan_in)),
        # reproduced deterministically from a JAX PRNG key.
        if key is None:
            key = jax.random.PRNGKey(42)
        bound = float(fan_in) ** -0.5
        self.bias = jax.random.uniform(
            key, (NB_CLASSES,), dtype=jnp.float32, minval=-bound, maxval=bound
        )

        # Hoisted out of the hot path: pre-transposed weight, padded in N only
        # (lane-dense output stores); K stays at its natural 404.
        Np = _round_up(NB_CLASSES, LANE)   # 101 -> 128
        self.weight_t_npad = (
            jnp.zeros((fan_in, Np), jnp.float32)
            .at[:, :NB_CLASSES]
            .set(self.weight.T)
        )
        self.bias_npad = (
            jnp.zeros((1, Np), jnp.float32).at[0, :NB_CLASSES].set(self.bias)
        )

    def __call__(self, x):
        if self.simple_mean:
            return tta_mean(x)
        x_flat = x.reshape(-1, self.fan_in)
        out = tta_linear(x_flat, self.weight_t_npad, self.bias_npad)
        # Lane slice back to 101 classes (only remaining post-op; fuse into the
        # consumer instead if latency at tiny batch is critical).
        return out[:, :NB_CLASSES]


# ----------------------------------------------------------------------------
# Main
# ----------------------------------------------------------------------------
if __name__ == "__main__":
    key = jax.random.PRNGKey(0)
    k_x, k_b = jax.random.split(key)

    batch = 2
    nb_transform = 4
    x = jax.random.normal(
        k_x, (batch, nb_transform, NB_CLASSES), dtype=jnp.float32
    )

    # --- linear path (simple_mean=False) ---
    model = TTAModelPallas(nb_transform, simple_mean=False, key=k_b)
    out = jax.block_until_ready(model(x))
    ref = x.reshape(-1, NB_CLASSES * nb_transform) @ model.weight.T + model.bias
    assert out.shape == (batch, NB_CLASSES)
    assert jnp.allclose(out, ref, atol=1e-4, rtol=1e-4)

    # --- simple_mean path ---
    model_sm = TTAModelPallas(nb_transform, simple_mean=True, key=k_b)
    out_sm = jax.block_until_ready(model_sm(x))
    ref_sm = x.mean(axis=1)
    assert out_sm.shape == (batch, NB_CLASSES)
    assert jnp.allclose(out_sm, ref_sm, atol=1e-5, rtol=1e-5)

    print("KERNEL_OK")
</pallas_src>

<mosaic_0001>
module attributes {stable_mosaic.version = 11 : i64} {
  func.func @_linear_kernel(%arg0: i32, %arg1: memref<8x404xf32, #tpu.memory_space<vmem>>, %arg2: memref<404x128xf32, #tpu.memory_space<vmem>>, %arg3: memref<1x128xf32, #tpu.memory_space<vmem>>, %arg4: memref<8x128xf32, #tpu.memory_space<vmem>>) attributes {dimension_semantics = [#tpu.dimension_semantics<parallel>], iteration_bounds = array<i64: 1>, scalar_prefetch = 0 : i64, scratch_operands = 0 : i64, tpu.core_type = #tpu.core_type<tc>, window_params = [{transform_indices = @transform_0, window_bounds = array<i64: 8, 404>}, {pipeline_mode = #tpu.pipeline_mode<synchronous>, transform_indices = @transform_1, window_bounds = array<i64: 404, 128>}, {pipeline_mode = #tpu.pipeline_mode<synchronous>, transform_indices = @transform_2, window_bounds = array<i64: 1, 128>}, {transform_indices = @transform_3, window_bounds = array<i64: 8, 128>}]} {
    %c0 = arith.constant 0 : index
    %c0_0 = arith.constant 0 : index
    %0 = vector.load %arg1[%c0, %c0_0] : memref<8x404xf32, #tpu.memory_space<vmem>>, vector<8x404xf32>
    %c0_1 = arith.constant 0 : index
    %c0_2 = arith.constant 0 : index
    %1 = vector.load %arg2[%c0_1, %c0_2] : memref<404x128xf32, #tpu.memory_space<vmem>>, vector<404x128xf32>
    %cst = arith.constant dense<0.000000e+00> : vector<8x128xf32>
    %2 = tpu.matmul %0, %1, %cst {dimension_numbers = #tpu.dot_dimension_numbers<[1], [0], [0], [1], [0, 0, 1, 1], [], []>} : vector<8x404xf32>, vector<404x128xf32>, vector<8x128xf32> -> vector<8x128xf32>
    %c0_3 = arith.constant 0 : index
    %c0_4 = arith.constant 0 : index
    %3 = vector.load %arg3[%c0_3, %c0_4] : memref<1x128xf32, #tpu.memory_space<vmem>>, vector<1x128xf32>
    %4 = vector.broadcast %3 : vector<1x128xf32> to vector<8x128xf32>
    %5 = arith.addf %2, %4 : vector<8x128xf32>
    %c0_5 = arith.constant 0 : index
    %c0_6 = arith.constant 0 : index
    %6 = vector.load %arg4[%c0_5, %c0_6] : memref<8x128xf32, #tpu.memory_space<vmem>>, vector<8x128xf32>
    tpu.vector_store %arg4[%c0_5, %c0_6], %5 {strides = array<i32>} : memref<8x128xf32, #tpu.memory_space<vmem>>, vector<8x128xf32>,
    return
  }
  func.func @transform_0(%arg0: i32) -> (i32, i32) {
    %c0_i32 = arith.constant 0 : i32
    %c0_i32_0 = arith.constant 0 : i32
    return %arg0, %c0_i32 : i32, i32
  }
  func.func @transform_1(%arg0: i32) -> (i32, i32) {
    %c0_i32 = arith.constant 0 : i32
    %c0_i32_0 = arith.constant 0 : i32
    %c0_i32_1 = arith.constant 0 : i32
    return %c0_i32, %c0_i32_0 : i32, i32
  }
  func.func @transform_2(%arg0: i32) -> (i32, i32) {
    %c0_i32 = arith.constant 0 : i32
    %c0_i32_0 = arith.constant 0 : i32
    %c0_i32_1 = arith.constant 0 : i32
    return %c0_i32, %c0_i32_0 : i32, i32
  }
  func.func @transform_3(%arg0: i32) -> (i32, i32) {
    %c0_i32 = arith.constant 0 : i32
    %c0_i32_0 = arith.constant 0 : i32
    return %arg0, %c0_i32 : i32, i32
  }
}

</mosaic_0001>

<bundles_post_ra>
// kernel: tpu_custom_call.1
= control target key start
LH: loop header
LB: loop body
LE: loop exit
PB: predicated region body
PF: predicated region fallthrough
CT: control target
= control target key end

     0   :  { %8 = vsyncpa [#allocation3], 0  ;;  %s359_s0 = inlined_call_operand.hbm [shape: f32[2,404], index: 0, kind: input, shape index: {}]   ;;  %s360_s1 = inlined_call_operand.hbm [shape: f32[404,128], index: 1, kind: input, shape index: {}]   ;;  %s361_s2 = inlined_call_operand.vmem [shape: f32[1,128], index: 2, kind: input, shape index: {}]   ;;  %s362_s3 = inlined_call_operand.hbm [shape: f32[2,128], index: 3, kind: output, shape index: {}]  }
   0x1   :  { %9 = vsyncpa [#allocation6], 0 }
   0x2   :  { %10 = vsyncpa [#allocation4], 0 }
   0x3   :  { %14 = vsyncadd [#allocation3], 384  ;;  %s15_s14 = sshll.u32 %s359_s0, 4  ;;  %s320_s15 = smov [#allocation2]   ;;  %s16_s14 = int_to_ptr.hbm [resolvable:$true] %s15_s14 }
   0x4   :  { %s17_s16 = sshll.u32 %s320_s15, 4  ;;  %s28_s19 = sshll.u32 %s360_s1, 4  ;;  %s18_s16 = int_to_ptr.vmem [resolvable:$true] %s17_s16  ;;  %s29_s19 = int_to_ptr.hbm [resolvable:$true] %s28_s19 }
   0x5   :  { %s321_s20 = smov 128   ;;  %s322_s21 = smov 8  }
   0x6   :  { %23 = dma.hbm_to_vmem [thread:$0]  %s16_s14, 128, %s18_s16, [#allocation3], %s321_s20, %s321_s20, %s322_s21  }
   0x7   :  { %s323_s22 = smov [#allocation5]  }
   0x8   :  { %s30_s23 = sshll.u32 %s323_s22, 4  ;;  %s31_s23 = int_to_ptr.vmem [resolvable:$true] %s30_s23 }
   0x9   :  { %36 = dma.hbm_to_vmem [thread:$0]  %s29_s19, 6528, %s31_s23, [#allocation6], %s321_s20, %s321_s20, %s322_s21  }
   0xa   :  { %314 = dma.done.wait [#allocation3], 512  }
   0xb   :  { %315 = vsyncadd [#allocation3], 4294966784 }
   0xc   :  { %316 = dma.done.wait [#allocation6], 6528  }
   0xd   :  { %317 = vsyncadd [#allocation6], 4294960768  ;;  %v98_v0 = vld [vmem:[#allocation5 + $0x178] sm:$0xff]  ;;  %v97_v2 = vld [vmem:[#allocation5 + $0x170] sm:$0xff]  ;;  %vm127_vm0 = vcmask 1043456   ;;  %vm124_vm1 = vcmask 162816  }
   0xe   :  { %v66_v1 = vld [vmem:[#allocation5 + $0x78] sm:$0xff]  ;;  %171 = vmatpush.msra.mxu2 %v98_v0  ;;  %v65_v3 = vld [vmem:[#allocation5 + $0x70] sm:$0xff]  ;;  %v96_v5 = vld [vmem:[#allocation5 + $0x168] sm:$0xff] }
   0xf   :  { %131 = vmatpush.msra.mxu0 %v66_v1  ;;  %v82_v4 = vld [vmem:[#allocation5 + $0xf8] sm:$0xff]  ;;  %v64_v6 = vld [vmem:[#allocation5 + $0x68] sm:$0xff]  ;;  %v81_v7 = vld [vmem:[#allocation5 + $0xf0] sm:$0xff] }
  0x10   :  { %151 = vmatpush.msra.mxu1 %v82_v4  ;;  %172 = vmatpush.msra.mxu2 %v97_v2  ;;  %v80_v8 = vld [vmem:[#allocation5 + $0xe8] sm:$0xff]  ;;  %v95_v9 = vld [vmem:[#allocation5 + $0x160] sm:$0xff]  ;;  %v94_v12 = vld [vmem:[#allocation5 + $0x158] sm:$0xff] }
  0x11   :  { %132 = vmatpush.msra.mxu0 %v65_v3  ;;  %v63_v10 = vld [vmem:[#allocation5 + $0x60] sm:$0xff]  ;;  %v62_v13 = vld [vmem:[#allocation5 + $0x58] sm:$0xff]  ;;  %v93_v15 = vld [vmem:[#allocation5 + $0x150] sm:$0xff] }
  0x12   :  { %152 = vmatpush.msra.mxu1 %v81_v7  ;;  %173 = vmatpush.msra.mxu2 %v96_v5  ;;  %v79_v11 = vld [vmem:[#allocation5 + $0xe0] sm:$0xff]  ;;  %v78_v14 = vld [vmem:[#allocation5 + $0xd8] sm:$0xff]  ;;  %v61_v16 = vld [vmem:[#allocation5 + $0x50] sm:$0xff] }
  0x13   :  { %133 = vmatpush.msra.mxu0 %v64_v6  ;;  %v77_v17 = vld [vmem:[#allocation5 + $0xd0] sm:$0xff]  ;;  %v92_v18 = vld [vmem:[#allocation5 + $0x148] sm:$0xff]  ;;  %v91_v21 = vld [vmem:[#allocation5 + $0x140] sm:$0xff] }
  0x14   :  { %153 = vmatpush.msra.mxu1 %v80_v8  ;;  %174 = vmatpush.msra.mxu2 %v95_v9  ;;  %v60_v19 = vld [vmem:[#allocation5 + $0x48] sm:$0xff]  ;;  %v59_v22 = vld [vmem:[#allocation5 + $0x40] sm:$0xff]  ;;  %v90_v23 = vld [vmem:[#allocation5 + $0x138] sm:$0xff] }
  0x15   :  { %134 = vmatpush.msra.mxu0 %v63_v10  ;;  %v76_v20 = vld [vmem:[#allocation5 + $0xc8] sm:$0xff]  ;;  %v58_v24 = vld [vmem:[#allocation5 + $0x38] sm:$0xff]  ;;  %v75_v25 = vld [vmem:[#allocation5 + $0xc0] sm:$0xff] }
  0x16   :  { %154 = vmatpush.msra.mxu1 %v79_v11  ;;  %175 = vmatpush.msra.mxu2 %v94_v12  ;;  %v89_v26 = vld [vmem:[#allocation5 + $0x130] sm:$0xff]  ;;  %v74_v29 = vld [vmem:[#allocation5 + $0xb8] sm:$0xff]  ;;  %v100_v30 = vld [vmem:[#allocation5 + $0x188] sm:$0xff] }
  0x17   :  { %135 = vmatpush.msra.mxu0 %v62_v13  ;;  %v57_v27 = vld [vmem:[#allocation5 + $0x30] sm:$0xff]  ;;  %v47_v31 = vld [vmem:[#allocation2] sm:$0xff]  ;;  %v48_v32 = vld [vmem:[#allocation2 + $0x8] sm:$0xff] }
  0x18   :  { %155 = vmatpush.msra.mxu1 %v78_v14  ;;  %176 = vmatpush.msra.mxu2 %v93_v15  ;;  %v101_v28 = vld [vmem:[#allocation5 + $0x190] sm:$0xf]  ;;  %v50_v34 = vld [vmem:[#allocation2 + $0x18] sm:$0xff]  ;;  %110 = vst [vmem:[#allocation1] ss:$4 sm:$0xff] %v47_v31  ;;  %v99_v36 = vld [vmem:[#allocation5 + $0x180] sm:$0xff] }
  0x19   :  { %136 = vmatpush.msra.mxu0 %v61_v16  ;;  %232 = vmatpush.msk.msra.mxu3 %vm127_vm0, %v101_v28  ;;  %v49_v33 = vld [vmem:[#allocation2 + $0x10] sm:$0xff]  ;;  %112 = vst [vmem:[#allocation1 + $0x1] ss:$4 sm:$0xff] %v48_v32  ;;  %v88_v37 = vld [vmem:[#allocation5 + $0x128] sm:$0xff]  ;;  %v87_v40 = vld [vmem:[#allocation5 + $0x120] sm:$0xff] }
  0x1a   :  { %156 = vmatpush.msra.mxu1 %v77_v17  ;;  %177 = vmatpush.msra.mxu2 %v92_v18  ;;  %v73_v35 = vld [vmem:[#allocation5 + $0xb0] sm:$0xff]  ;;  %v56_v38 = vld [vmem:[#allocation5 + $0x28] sm:$0xff]  ;;  %114 = vst [vmem:[#allocation1 + $0x2] ss:$4 sm:$0xff] %v49_v33  ;;  %v55_v41 = vld [vmem:[#allocation5 + $0x20] sm:$0xff] }
  0x1b   :  { %137 = vmatpush.msra.mxu0 %v60_v19  ;;  %205 = vmatpush.msra.mxu3 %v100_v30  ;;  %v72_v39 = vld [vmem:[#allocation5 + $0xa8] sm:$0xff]  ;;  %116 = vst [vmem:[#allocation1 + $0x3] ss:$4 sm:$0xff] %v50_v34  ;;  %v71_v42 = vld [vmem:[#allocation5 + $0xa0] sm:$0xff]  ;;  %v86_v43 = vld [vmem:[#allocation5 + $0x118] sm:$0xff] }
  0x1c   :  { %157 = vmatpush.msra.mxu1 %v76_v20  ;;  %178 = vmatpush.msra.mxu2 %v91_v21  ;;  %v54_v44 = vld [vmem:[#allocation5 + $0x18] sm:$0xff]  ;;  %v85_v46 = vld [vmem:[#allocation5 + $0x110] sm:$0xff]  ;;  %v84_v49 = vld [vmem:[#allocation5 + $0x108] sm:$0xff] }
  0x1d   :  { %138 = vmatpush.msra.mxu0 %v59_v22  ;;  %206 = vmatpush.msra.mxu3 %v99_v36  ;;  %v70_v45 = vld [vmem:[#allocation5 + $0x98] sm:$0xff]  ;;  %v53_v47 = vld [vmem:[#allocation5 + $0x10] sm:$0xff]  ;;  %v52_v50 = vld [vmem:[#allocation5 + $0x8] sm:$0xff] }
  0x1e   :  { %158 = vmatpush.msra.mxu1 %v75_v25  ;;  %179 = vmatpush.msra.mxu2 %v90_v23  ;;  %v69_v48 = vld [vmem:[#allocation5 + $0x90] sm:$0xff]  ;;  %v68_v51 = vld [vmem:[#allocation5 + $0x88] sm:$0xff]  ;;  %v83_v53 = vld [vmem:[#allocation5 + $0x100] sm:$0xff] }
  0x1f   :  { %139 = vmatpush.msra.mxu0 %v58_v24  ;;  %v51_v54 = vld [vmem:[#allocation5] sm:$0xff]  ;;  %v241_v59 = vld [vmem:[%s361_s2] ss:$0 sm:$0xff] }
  0x20   :  { %159 = vmatpush.msra.mxu1 %v74_v29  ;;  %180 = vmatpush.msra.mxu2 %v89_v26  ;;  %v67_v57 = vld [vmem:[#allocation5 + $0x80] sm:$0xff] }
  0x21   :  { %140 = vmatpush.msra.mxu0 %v57_v27 }
  0x22   :  { %160 = vmatpush.msra.mxu1 %v73_v35  ;;  %181 = vmatpush.msra.mxu2 %v88_v37  ;;  %v120_v52 = vld.sshfl [vmem:[#allocation1 + $0x18] sm:$0xff pattern:$0x73625140]  ;;  %v119_v55 = vld.sshfl [vmem:[#allocation1 + $0x10] sm:$0xff pattern:$0x73625140] }
  0x23   :  { %141 = vmatpush.msra.mxu0 %v56_v38  ;;  %233 = vmatmul.msk.f32.vlgmr.msra.gmra.mxu3 %vm124_vm1, %v120_v52  ;;  %v117_v56 = vld.sshfl [vmem:[#allocation1] sm:$0xff pattern:$0x73625140]  ;;  %v118_v58 = vld.sshfl [vmem:[#allocation1 + $0x8] sm:$0xff pattern:$0x73625140] }
  0x24   :  { %161 = vmatpush.msra.mxu1 %v72_v39  ;;  %182 = vmatpush.msra.mxu2 %v87_v40 }
  0x25   :  { %142 = vmatpush.msra.mxu0 %v55_v41 }
  0x26   :  { %162 = vmatpush.msra.mxu1 %v71_v42  ;;  %183 = vmatpush.msra.mxu2 %v86_v43 }
  0x27   :  { %143 = vmatpush.msra.mxu0 %v54_v44 }
  0x28   :  { %163 = vmatpush.msra.mxu1 %v70_v45  ;;  %184 = vmatpush.msra.mxu2 %v85_v46 }
  0x29   :  { %144 = vmatpush.msra.mxu0 %v53_v47 }
  0x2a   :  { %164 = vmatpush.msra.mxu1 %v69_v48  ;;  %185 = vmatpush.msra.mxu2 %v84_v49 }
  0x2b   :  { %145 = vmatpush.msra.mxu0 %v52_v50 }
  0x2c   :  { %165 = vmatpush.msra.mxu1 %v68_v51  ;;  %186 = vmatpush.msra.mxu2 %v83_v53 }
  0x2d   :  { %146 = vmatpush.msra.mxu0 %v51_v54  ;;  %187 = vmatmul.f32.vlgmr.msra.gmra.mxu2 %v119_v55 }
  0x2e   :  { %147 = vmatmul.f32.vlgmr.msra.gmra.mxu0 %v117_v56  ;;  %166 = vmatpush.msra.mxu1 %v67_v57 }
  0x2f   :  { %167 = vmatmul.f32.vlgmr.msra.gmra.mxu1 %v118_v58 }
  0xa6   :  { %v208_v1 = vpop.f32.mrf.mxu3 }
  0xab   :  { %v148_v60 = vpop.f32.mrf.mxu0 }
  0xac   :  { %v149_v61 = vadd.f32 %v241_v59, %v148_v60  ;;  %v168_v62 = vpop.f32.mrf.mxu1 }
  0xae   :  { %v169_v63 = vadd.f32 %v168_v62, %v149_v61 }
  0xb0   :  { %v188_v0 = vpop.f32.mrf.mxu2 }
  0xb1   :  { %v189_v2 = vadd.f32 %v188_v0, %v169_v63 }
  0xb3   :  { %v209_v3 = vadd.f32 %v208_v1, %v189_v2 }
  0xb5   :  { %211 = vst [vmem:[#allocation7] sm:$0xff] %v209_v3 }
  0xb6   :  { %215 = vsyncadd [#allocation4], 96  ;;  %s218_s26 = sshll.u32 %s362_s3, 4  ;;  %s324_s27 = smov [#allocation7]   ;;  %s219_s26 = int_to_ptr.hbm [resolvable:$true] %s218_s26 }
  0xb7   :  { %s216_s28 = sshll.u32 %s324_s27, 4  ;;  %s325_s29 = smov 32   ;;  %s217_s28 = int_to_ptr.vmem [resolvable:$true] %s216_s28 }
  0xb8   :  { %s326_s2 = smov 2  }
  0xb9   :  { %224 = dma.vmem_to_hbm [thread:$0]  %s217_s28, 32, %s219_s26, [#allocation4], %s325_s29, %s325_s29, %s326_s2  }
  0xba   :  { %318 = dma.done.wait [#allocation4], 128  }
  0xbb   :  { %319 = vsyncadd [#allocation4], 4294967168 }
  0xbc   :  { %229 = vsyncpa [#allocation3], 1 }
  0xbd   :  { %230 = vsyncpa [#allocation6], 1 }
  0xbe   :  { %231 = vsyncpa [#allocation4], 1 }

</bundles_post_ra>
